<compile_context>
chip_gen: v7x
topology: tpu7x:2x2x1
jax: 0.10.0
libtpu: 0.0.40
codegen_flags: <defaults>
</compile_context>

<pallas_src>
import functools

import jax
import jax.numpy as jnp
from jax import lax
from jax.experimental import pallas as pl
from jax.experimental.pallas import tpu as pltpu


def _round_up(x, m):
    return ((x + m - 1) // m) * m


def _round_down(x, m):
    return (x // m) * m


def _leaky_relu(x, slope):
    return jnp.where(x > 0, x, slope * x)


def _type_encoder_kernel(mlp_num, use_bf16_matmul, z_ref, *rest):
    """rest = [w1, b1, w_0, b_0, ..., w_{mlp_num-1}, b_{mlp_num-1}, w_out, b_out, o_ref].

    z_ref   : (block_n, in_dim)            natural batch-major tile
    weights : (out_feat, in_feat)          PyTorch layout
    biases  : (out_feat, 1)
    o_ref   : (out_features, block_n)      feature-major, lane-dense store

    Activations live as (features, block_n): batch on the 128-lane axis, so
    all VPU work and the output store are lane-dense.
    """
    w1_ref, b1_ref = rest[0], rest[1]
    hidden_refs = rest[2:2 + 2 * mlp_num]
    w_out_ref = rest[2 + 2 * mlp_num]
    b_out_ref = rest[3 + 2 * mlp_num]
    o_ref = rest[4 + 2 * mlp_num]

    def cast(v):
        return v.astype(jnp.bfloat16) if use_bf16_matmul else v

    # linear_1 + leaky_relu(0.02).  Contract in_dim of both operands so the
    # (block_n, in_dim) tile is consumed directly (w1 @ z^T on the MXU) --
    # no wrapper-side transpose pass over z.
    x = lax.dot_general(
        cast(w1_ref[...]), cast(z_ref[...]),
        dimension_numbers=(((1,), (1,)), ((), ())),
        preferred_element_type=jnp.float32)
    x = _leaky_relu(x + b1_ref[...], 0.02)

    # mlp_num hidden layers + leaky_relu(0.01)
    for i in range(mlp_num):
        w = hidden_refs[2 * i][...]
        b = hidden_refs[2 * i + 1][...]
        x = jnp.dot(cast(w), cast(x), preferred_element_type=jnp.float32)
        x = _leaky_relu(x + b, 0.01)

    # linear_out (no activation); lane-dense (out_features, block_n) store.
    x = jnp.dot(cast(w_out_ref[...]), cast(x), preferred_element_type=jnp.float32)
    o_ref[...] = (x + b_out_ref[...]).astype(o_ref.dtype)


def type_encoder_forward(z, params, *, mlp_num=4, out_dim=1, block_n=None,
                         use_bf16_matmul=False):
    """Fused TypeEncoder forward.  z: (N, in_dim) f32 -> (N, out_dim, 2, 2, 2)."""
    N, in_dim = z.shape
    w1 = params["w1"]                        # (df_dim, in_dim)
    df_dim = w1.shape[0]
    w_out = params["w_out"]                  # (out_dim*8, df_dim)
    out_features = w_out.shape[0]
    assert out_features == out_dim * 8

    # ---- batch tiling -----------------------------------------------------
    # Batch is the 128-lane axis inside the kernel.  Large tiles amortize the
    # per-grid-step overhead; cap block_n so grid >= 2 when the batch allows
    # it (v7x has two TensorCores sharded over the "parallel" axis).
    if block_n is None:
        block_n = 2048
    block_n = max(128, _round_down(block_n, 128))
    n_ceil = _round_up(N, 128)
    block_n = min(block_n, n_ceil)
    if n_ceil >= 2 * 128:
        block_n = min(block_n, max(128, _round_down(n_ceil // 2, 128)))

    n_pad = _round_up(N, block_n)
    grid = (n_pad // block_n,)

    # z stays in its natural (N, in_dim) layout; pad the batch axis only when
    # the tile does not divide it.
    z_in = z if n_pad == N else jnp.pad(z, ((0, n_pad - N), (0, 0)))

    flat_params = [params["w1"], params["b1"]]
    for i in range(mlp_num):
        flat_params += [params[f"w_{i}"], params[f"b_{i}"]]
    flat_params += [params["w_out"], params["b_out"]]

    kernel = functools.partial(_type_encoder_kernel, mlp_num, use_bf16_matmul)

    # Grid-invariant parameters: block == full array, constant index_map.
    in_specs = [pl.BlockSpec((block_n, in_dim), lambda i: (i, 0))]
    in_specs += [pl.BlockSpec(p.shape, lambda i: (0, 0)) for p in flat_params]
    out_spec = pl.BlockSpec((out_features, block_n), lambda i: (0, i))

    # Tight-but-safe VMEM budget: ~2x estimated footprint, floor 8 MiB.
    def _padded_bytes(shape):
        r, c = shape
        return _round_up(r, 8) * _round_up(c, 128) * 4

    param_vmem = sum(_padded_bytes(p.shape) for p in flat_params)
    z_tile_vmem = block_n * _round_up(in_dim, 128) * 4
    out_tile_vmem = _round_up(out_features, 8) * block_n * 4
    act_vmem = 4 * _round_up(df_dim, 8) * block_n * 4
    est = 2 * param_vmem + 2 * (z_tile_vmem + out_tile_vmem) + act_vmem
    vmem_limit = int(min(48 * 1024 * 1024, max(8 * 1024 * 1024, 2 * est)))

    flops = int(2 * n_pad * (in_dim * df_dim + mlp_num * df_dim * df_dim
                             + df_dim * out_features))
    param_bytes = int(sum(int(p.size) * p.dtype.itemsize for p in flat_params))
    bytes_accessed = int(4 * n_pad * (in_dim + out_features) + param_bytes)
    cost = pl.CostEstimate(flops=flops, transcendentals=0,
                           bytes_accessed=bytes_accessed)

    out_t = pl.pallas_call(
        kernel,
        out_shape=jax.ShapeDtypeStruct((out_features, n_pad), jnp.float32),
        grid_spec=pltpu.PrefetchScalarGridSpec(
            num_scalar_prefetch=0,
            grid=grid,
            in_specs=in_specs,
            out_specs=out_spec,
        ),
        compiler_params=pltpu.CompilerParams(
            dimension_semantics=("parallel",),
            vmem_limit_bytes=vmem_limit,
        ),
        cost_estimate=cost,
    )(z_in, *flat_params)

    # Option A (review): keep the lane-dense feature-major kernel output and
    # fuse the transpose into the consumer (one XLA transpose+reshape pass
    # under jit).  Option B (in-kernel transpose to batch-major tiles) is a
    # benchmark candidate once a bundle dump is available.
    out2d = jnp.transpose(out_t)[:N]                 # (N, out_features)
    return out2d.reshape(-1, out_dim, 2, 2, 2)       # same as torch .view(...)


# ------------------------- init / reference / test -------------------------

def _xavier_uniform(key, fan_out, fan_in):
    # Matches torch.nn.init.xavier_uniform_ on a (out, in) weight.
    bound = (6.0 / (fan_in + fan_out)) ** 0.5
    return jax.random.uniform(key, (fan_out, fan_in), jnp.float32, -bound, bound)


def init_type_encoder_params(key, in_dim, df_dim, mlp_num=4, out_dim=1):
    keys = jax.random.split(key, mlp_num + 2)
    params = {
        "w1": _xavier_uniform(keys[0], df_dim, in_dim),
        "b1": jnp.zeros((df_dim, 1), jnp.float32),
    }
    for i in range(mlp_num):
        params[f"w_{i}"] = _xavier_uniform(keys[1 + i], df_dim, df_dim)
        params[f"b_{i}"] = jnp.zeros((df_dim, 1), jnp.float32)
    params["w_out"] = _xavier_uniform(keys[-1], out_dim * 8, df_dim)
    params["b_out"] = jnp.zeros((out_dim * 8, 1), jnp.float32)
    return params


def _reference_forward(z, params, mlp_num=4, out_dim=1):
    x = z @ params["w1"].T + params["b1"].T
    x = jnp.where(x > 0, x, 0.02 * x)
    for i in range(mlp_num):
        x = x @ params[f"w_{i}"].T + params[f"b_{i}"].T
        x = jnp.where(x > 0, x, 0.01 * x)
    x = x @ params["w_out"].T + params["b_out"].T
    return x.reshape(-1, out_dim, 2, 2, 2)


if __name__ == "__main__":
    in_dim, df_dim, mlp_num, out_dim = 16, 32, 4, 1

    key = jax.random.PRNGKey(0)
    k_param, k_z1, k_z2, k_z3 = jax.random.split(key, 4)
    params = init_type_encoder_params(k_param, in_dim, df_dim, mlp_num, out_dim)

    fwd = jax.jit(functools.partial(type_encoder_forward,
                                    mlp_num=mlp_num, out_dim=out_dim))

    # Small batch: exercises batch-axis padding (single grid step).
    z_small = jax.random.normal(k_z1, (8, in_dim), jnp.float32)
    out_small = jax.block_until_ready(fwd(z_small, params))
    ref_small = _reference_forward(z_small, params, mlp_num, out_dim)
    assert out_small.shape == (8, out_dim, 2, 2, 2), out_small.shape
    assert jnp.allclose(out_small, ref_small, atol=1e-4, rtol=1e-4), "small-batch mismatch"

    # Larger batch: grid >= 2 ("parallel" axis / megacore path, no padding).
    z_big = jax.random.normal(k_z2, (1024, in_dim), jnp.float32)
    out_big = jax.block_until_ready(fwd(z_big, params))
    ref_big = _reference_forward(z_big, params, mlp_num, out_dim)
    assert out_big.shape == (1024, out_dim, 2, 2, 2), out_big.shape
    assert jnp.allclose(out_big, ref_big, atol=1e-4, rtol=1e-4), "big-batch mismatch"

    # Ragged batch: multi-step grid with a padded final tile.
    z_rag = jax.random.normal(k_z3, (600, in_dim), jnp.float32)
    out_rag = jax.block_until_ready(fwd(z_rag, params))
    ref_rag = _reference_forward(z_rag, params, mlp_num, out_dim)
    assert out_rag.shape == (600, out_dim, 2, 2, 2), out_rag.shape
    assert jnp.allclose(out_rag, ref_rag, atol=1e-4, rtol=1e-4), "ragged-batch mismatch"

    print("KERNEL_OK")
</pallas_src>

<mosaic_0001>
module attributes {stable_mosaic.version = 11 : i64} {
  func.func @_type_encoder_kernel(%arg0: i32, %arg1: memref<128x16xf32, #tpu.memory_space<vmem>>, %arg2: memref<32x16xf32, #tpu.memory_space<vmem>>, %arg3: memref<32x1xf32, #tpu.memory_space<vmem>>, %arg4: memref<32x32xf32, #tpu.memory_space<vmem>>, %arg5: memref<32x1xf32, #tpu.memory_space<vmem>>, %arg6: memref<32x32xf32, #tpu.memory_space<vmem>>, %arg7: memref<32x1xf32, #tpu.memory_space<vmem>>, %arg8: memref<32x32xf32, #tpu.memory_space<vmem>>, %arg9: memref<32x1xf32, #tpu.memory_space<vmem>>, %arg10: memref<32x32xf32, #tpu.memory_space<vmem>>, %arg11: memref<32x1xf32, #tpu.memory_space<vmem>>, %arg12: memref<8x32xf32, #tpu.memory_space<vmem>>, %arg13: memref<8x1xf32, #tpu.memory_space<vmem>>, %arg14: memref<8x128xf32, #tpu.memory_space<vmem>>) attributes {dimension_semantics = [#tpu.dimension_semantics<parallel>], iteration_bounds = array<i64: 1>, scalar_prefetch = 0 : i64, scratch_operands = 0 : i64, tpu.core_type = #tpu.core_type<tc>, window_params = [{transform_indices = @transform_0, window_bounds = array<i64: 128, 16>}, {pipeline_mode = #tpu.pipeline_mode<synchronous>, transform_indices = @transform_1, window_bounds = array<i64: 32, 16>}, {pipeline_mode = #tpu.pipeline_mode<synchronous>, transform_indices = @transform_2, window_bounds = array<i64: 32, 1>}, {pipeline_mode = #tpu.pipeline_mode<synchronous>, transform_indices = @transform_3, window_bounds = array<i64: 32, 32>}, {pipeline_mode = #tpu.pipeline_mode<synchronous>, transform_indices = @transform_4, window_bounds = array<i64: 32, 1>}, {pipeline_mode = #tpu.pipeline_mode<synchronous>, transform_indices = @transform_5, window_bounds = array<i64: 32, 32>}, {pipeline_mode = #tpu.pipeline_mode<synchronous>, transform_indices = @transform_6, window_bounds = array<i64: 32, 1>}, {pipeline_mode = #tpu.pipeline_mode<synchronous>, transform_indices = @transform_7, window_bounds = array<i64: 32, 32>}, {pipeline_mode = #tpu.pipeline_mode<synchronous>, transform_indices = @transform_8, window_bounds = array<i64: 32, 1>}, {pipeline_mode = #tpu.pipeline_mode<synchronous>, transform_indices = @transform_9, window_bounds = array<i64: 32, 32>}, {pipeline_mode = #tpu.pipeline_mode<synchronous>, transform_indices = @transform_10, window_bounds = array<i64: 32, 1>}, {pipeline_mode = #tpu.pipeline_mode<synchronous>, transform_indices = @transform_11, window_bounds = array<i64: 8, 32>}, {pipeline_mode = #tpu.pipeline_mode<synchronous>, transform_indices = @transform_12, window_bounds = array<i64: 8, 1>}, {transform_indices = @transform_13, window_bounds = array<i64: 8, 128>}]} {
    %c0 = arith.constant 0 : index
    %c0_0 = arith.constant 0 : index
    %0 = vector.load %arg2[%c0, %c0_0] : memref<32x16xf32, #tpu.memory_space<vmem>>, vector<32x16xf32>
    %c0_1 = arith.constant 0 : index
    %c0_2 = arith.constant 0 : index
    %1 = vector.load %arg1[%c0_1, %c0_2] : memref<128x16xf32, #tpu.memory_space<vmem>>, vector<128x16xf32>
    %cst = arith.constant dense<0.000000e+00> : vector<32x128xf32>
    %2 = tpu.matmul %0, %1, %cst {dimension_numbers = #tpu.dot_dimension_numbers<[1], [1], [0], [0], [0, 0, 1, 0], [], []>} : vector<32x16xf32>, vector<128x16xf32>, vector<32x128xf32> -> vector<32x128xf32>
    %c0_3 = arith.constant 0 : index
    %c0_4 = arith.constant 0 : index
    %3 = vector.load %arg3[%c0_3, %c0_4] : memref<32x1xf32, #tpu.memory_space<vmem>>, vector<32x1xf32>
    %4 = vector.broadcast %3 : vector<32x1xf32> to vector<32x128xf32>
    %5 = arith.addf %2, %4 : vector<32x128xf32>
    %cst_5 = arith.constant 0.000000e+00 : f32
    %6 = vector.broadcast %cst_5 : f32 to vector<32x128xf32>
    %7 = arith.cmpf ogt, %5, %6 : vector<32x128xf32>
    %cst_6 = arith.constant 2.000000e-02 : f32
    %8 = vector.broadcast %cst_6 : f32 to vector<32x128xf32>
    %9 = arith.mulf %8, %5 : vector<32x128xf32>
    %10 = arith.select %7, %5, %9 : vector<32x128xi1>, vector<32x128xf32>
    %c0_7 = arith.constant 0 : index
    %c0_8 = arith.constant 0 : index
    %11 = vector.load %arg4[%c0_7, %c0_8] : memref<32x32xf32, #tpu.memory_space<vmem>>, vector<32x32xf32>
    %c0_9 = arith.constant 0 : index
    %c0_10 = arith.constant 0 : index
    %12 = vector.load %arg5[%c0_9, %c0_10] : memref<32x1xf32, #tpu.memory_space<vmem>>, vector<32x1xf32>
    %cst_11 = arith.constant dense<0.000000e+00> : vector<32x128xf32>
    %13 = tpu.matmul %11, %10, %cst_11 {dimension_numbers = #tpu.dot_dimension_numbers<[1], [0], [0], [1], [0, 0, 1, 1], [], []>} : vector<32x32xf32>, vector<32x128xf32>, vector<32x128xf32> -> vector<32x128xf32>
    %14 = vector.broadcast %12 : vector<32x1xf32> to vector<32x128xf32>
    %15 = arith.addf %13, %14 : vector<32x128xf32>
    %cst_12 = arith.constant 0.000000e+00 : f32
    %16 = vector.broadcast %cst_12 : f32 to vector<32x128xf32>
    %17 = arith.cmpf ogt, %15, %16 : vector<32x128xf32>
    %cst_13 = arith.constant 0.00999999977 : f32
    %18 = vector.broadcast %cst_13 : f32 to vector<32x128xf32>
    %19 = arith.mulf %18, %15 : vector<32x128xf32>
    %20 = arith.select %17, %15, %19 : vector<32x128xi1>, vector<32x128xf32>
    %c0_14 = arith.constant 0 : index
    %c0_15 = arith.constant 0 : index
    %21 = vector.load %arg6[%c0_14, %c0_15] : memref<32x32xf32, #tpu.memory_space<vmem>>, vector<32x32xf32>
    %c0_16 = arith.constant 0 : index
    %c0_17 = arith.constant 0 : index
    %22 = vector.load %arg7[%c0_16, %c0_17] : memref<32x1xf32, #tpu.memory_space<vmem>>, vector<32x1xf32>
    %cst_18 = arith.constant dense<0.000000e+00> : vector<32x128xf32>
    %23 = tpu.matmul %21, %20, %cst_18 {dimension_numbers = #tpu.dot_dimension_numbers<[1], [0], [0], [1], [0, 0, 1, 1], [], []>} : vector<32x32xf32>, vector<32x128xf32>, vector<32x128xf32> -> vector<32x128xf32>
    %24 = vector.broadcast %22 : vector<32x1xf32> to vector<32x128xf32>
    %25 = arith.addf %23, %24 : vector<32x128xf32>
    %cst_19 = arith.constant 0.000000e+00 : f32
    %26 = vector.broadcast %cst_19 : f32 to vector<32x128xf32>
    %27 = arith.cmpf ogt, %25, %26 : vector<32x128xf32>
    %cst_20 = arith.constant 0.00999999977 : f32
    %28 = vector.broadcast %cst_20 : f32 to vector<32x128xf32>
    %29 = arith.mulf %28, %25 : vector<32x128xf32>
    %30 = arith.select %27, %25, %29 : vector<32x128xi1>, vector<32x128xf32>
    %c0_21 = arith.constant 0 : index
    %c0_22 = arith.constant 0 : index
    %31 = vector.load %arg8[%c0_21, %c0_22] : memref<32x32xf32, #tpu.memory_space<vmem>>, vector<32x32xf32>
    %c0_23 = arith.constant 0 : index
    %c0_24 = arith.constant 0 : index
    %32 = vector.load %arg9[%c0_23, %c0_24] : memref<32x1xf32, #tpu.memory_space<vmem>>, vector<32x1xf32>
    %cst_25 = arith.constant dense<0.000000e+00> : vector<32x128xf32>
    %33 = tpu.matmul %31, %30, %cst_25 {dimension_numbers = #tpu.dot_dimension_numbers<[1], [0], [0], [1], [0, 0, 1, 1], [], []>} : vector<32x32xf32>, vector<32x128xf32>, vector<32x128xf32> -> vector<32x128xf32>
    %34 = vector.broadcast %32 : vector<32x1xf32> to vector<32x128xf32>
    %35 = arith.addf %33, %34 : vector<32x128xf32>
    %cst_26 = arith.constant 0.000000e+00 : f32
    %36 = vector.broadcast %cst_26 : f32 to vector<32x128xf32>
    %37 = arith.cmpf ogt, %35, %36 : vector<32x128xf32>
    %cst_27 = arith.constant 0.00999999977 : f32
    %38 = vector.broadcast %cst_27 : f32 to vector<32x128xf32>
    %39 = arith.mulf %38, %35 : vector<32x128xf32>
    %40 = arith.select %37, %35, %39 : vector<32x128xi1>, vector<32x128xf32>
    %c0_28 = arith.constant 0 : index
    %c0_29 = arith.constant 0 : index
    %41 = vector.load %arg10[%c0_28, %c0_29] : memref<32x32xf32, #tpu.memory_space<vmem>>, vector<32x32xf32>
    %c0_30 = arith.constant 0 : index
    %c0_31 = arith.constant 0 : index
    %42 = vector.load %arg11[%c0_30, %c0_31] : memref<32x1xf32, #tpu.memory_space<vmem>>, vector<32x1xf32>
    %cst_32 = arith.constant dense<0.000000e+00> : vector<32x128xf32>
    %43 = tpu.matmul %41, %40, %cst_32 {dimension_numbers = #tpu.dot_dimension_numbers<[1], [0], [0], [1], [0, 0, 1, 1], [], []>} : vector<32x32xf32>, vector<32x128xf32>, vector<32x128xf32> -> vector<32x128xf32>
    %44 = vector.broadcast %42 : vector<32x1xf32> to vector<32x128xf32>
    %45 = arith.addf %43, %44 : vector<32x128xf32>
    %cst_33 = arith.constant 0.000000e+00 : f32
    %46 = vector.broadcast %cst_33 : f32 to vector<32x128xf32>
    %47 = arith.cmpf ogt, %45, %46 : vector<32x128xf32>
    %cst_34 = arith.constant 0.00999999977 : f32
    %48 = vector.broadcast %cst_34 : f32 to vector<32x128xf32>
    %49 = arith.mulf %48, %45 : vector<32x128xf32>
    %50 = arith.select %47, %45, %49 : vector<32x128xi1>, vector<32x128xf32>
    %c0_35 = arith.constant 0 : index
    %c0_36 = arith.constant 0 : index
    %51 = vector.load %arg12[%c0_35, %c0_36] : memref<8x32xf32, #tpu.memory_space<vmem>>, vector<8x32xf32>
    %cst_37 = arith.constant dense<0.000000e+00> : vector<8x128xf32>
    %52 = tpu.matmul %51, %50, %cst_37 {dimension_numbers = #tpu.dot_dimension_numbers<[1], [0], [0], [1], [0, 0, 1, 1], [], []>} : vector<8x32xf32>, vector<32x128xf32>, vector<8x128xf32> -> vector<8x128xf32>
    %c0_38 = arith.constant 0 : index
    %c0_39 = arith.constant 0 : index
    %53 = vector.load %arg13[%c0_38, %c0_39] : memref<8x1xf32, #tpu.memory_space<vmem>>, vector<8x1xf32>
    %54 = vector.broadcast %53 : vector<8x1xf32> to vector<8x128xf32>
    %55 = arith.addf %52, %54 : vector<8x128xf32>
    %c0_40 = arith.constant 0 : index
    %c0_41 = arith.constant 0 : index
    %56 = vector.load %arg14[%c0_40, %c0_41] : memref<8x128xf32, #tpu.memory_space<vmem>>, vector<8x128xf32>
    tpu.vector_store %arg14[%c0_40, %c0_41], %55 {strides = array<i32>} : memref<8x128xf32, #tpu.memory_space<vmem>>, vector<8x128xf32>,
    return
  }
  func.func @transform_0(%arg0: i32) -> (i32, i32) {
    %c0_i32 = arith.constant 0 : i32
    %c0_i32_0 = arith.constant 0 : i32
    return %arg0, %c0_i32 : i32, i32
  }
  func.func @transform_1(%arg0: i32) -> (i32, i32) {
    %c0_i32 = arith.constant 0 : i32
    %c0_i32_0 = arith.constant 0 : i32
    %c0_i32_1 = arith.constant 0 : i32
    return %c0_i32, %c0_i32_0 : i32, i32
  }
  func.func @transform_2(%arg0: i32) -> (i32, i32) {
    %c0_i32 = arith.constant 0 : i32
    %c0_i32_0 = arith.constant 0 : i32
    %c0_i32_1 = arith.constant 0 : i32
    return %c0_i32, %c0_i32_0 : i32, i32
  }
  func.func @transform_3(%arg0: i32) -> (i32, i32) {
    %c0_i32 = arith.constant 0 : i32
    %c0_i32_0 = arith.constant 0 : i32
    %c0_i32_1 = arith.constant 0 : i32
    return %c0_i32, %c0_i32_0 : i32, i32
  }
  func.func @transform_4(%arg0: i32) -> (i32, i32) {
    %c0_i32 = arith.constant 0 : i32
    %c0_i32_0 = arith.constant 0 : i32
    %c0_i32_1 = arith.constant 0 : i32
    return %c0_i32, %c0_i32_0 : i32, i32
  }
  func.func @transform_5(%arg0: i32) -> (i32, i32) {
    %c0_i32 = arith.constant 0 : i32
    %c0_i32_0 = arith.constant 0 : i32
    %c0_i32_1 = arith.constant 0 : i32
    return %c0_i32, %c0_i32_0 : i32, i32
  }
  func.func @transform_6(%arg0: i32) -> (i32, i32) {
    %c0_i32 = arith.constant 0 : i32
    %c0_i32_0 = arith.constant 0 : i32
    %c0_i32_1 = arith.constant 0 : i32
    return %c0_i32, %c0_i32_0 : i32, i32
  }
  func.func @transform_7(%arg0: i32) -> (i32, i32) {
    %c0_i32 = arith.constant 0 : i32
    %c0_i32_0 = arith.constant 0 : i32
    %c0_i32_1 = arith.constant 0 : i32
    return %c0_i32, %c0_i32_0 : i32, i32
  }
  func.func @transform_8(%arg0: i32) -> (i32, i32) {
    %c0_i32 = arith.constant 0 : i32
    %c0_i32_0 = arith.constant 0 : i32
    %c0_i32_1 = arith.constant 0 : i32
    return %c0_i32, %c0_i32_0 : i32, i32
  }
  func.func @transform_9(%arg0: i32) -> (i32, i32) {
    %c0_i32 = arith.constant 0 : i32
    %c0_i32_0 = arith.constant 0 : i32
    %c0_i32_1 = arith.constant 0 : i32
    return %c0_i32, %c0_i32_0 : i32, i32
  }
  func.func @transform_10(%arg0: i32) -> (i32, i32) {
    %c0_i32 = arith.constant 0 : i32
    %c0_i32_0 = arith.constant 0 : i32
    %c0_i32_1 = arith.constant 0 : i32
    return %c0_i32, %c0_i32_0 : i32, i32
  }
  func.func @transform_11(%arg0: i32) -> (i32, i32) {
    %c0_i32 = arith.constant 0 : i32
    %c0_i32_0 = arith.constant 0 : i32
    %c0_i32_1 = arith.constant 0 : i32
    return %c0_i32, %c0_i32_0 : i32, i32
  }
  func.func @transform_12(%arg0: i32) -> (i32, i32) {
    %c0_i32 = arith.constant 0 : i32
    %c0_i32_0 = arith.constant 0 : i32
    %c0_i32_1 = arith.constant 0 : i32
    return %c0_i32, %c0_i32_0 : i32, i32
  }
  func.func @transform_13(%arg0: i32) -> (i32, i32) {
    %c0_i32 = arith.constant 0 : i32
    %c0_i32_0 = arith.constant 0 : i32
    return %c0_i32, %arg0 : i32, i32
  }
}

</mosaic_0001>

<bundles_post_ra>
// kernel: type_encoder_forward.1
= control target key start
LH: loop header
LB: loop body
LE: loop exit
PB: predicated region body
PF: predicated region fallthrough
CT: control target
= control target key end

     0   :  { %vm89_vm0 = vcmask 130048   ;;  %v1207_v6 = vmov 0   ;;  %s1527_s0 = inlined_call_operand.vmem [shape: f32[128,16], index: 0, kind: input, shape index: {}]   ;;  %s1528_s1 = inlined_call_operand.vmem [shape: f32[32,16], index: 1, kind: input, shape index: {}]   ;;  %s1529_s2 = inlined_call_operand.vmem [shape: f32[32,1], index: 2, kind: input, shape index: {}]   ;;  %s1530_s3 = inlined_call_operand.vmem [shape: f32[32,32], index: 3, kind: input, shape index: {}]   ;;  %s1531_s4 = inlined_call_operand.vmem [shape: f32[32,1], index: 4, kind: input, shape index: {}]   ;;  %s1532_s5 = inlined_call_operand.vmem [shape: f32[32,32], index: 5, kind: input, shape index: {}]   ;;  %s1533_s6 = inlined_call_operand.vmem [shape: f32[32,1], index: 6, kind: input, shape index: {}]   ;;  %s1534_s7 = inlined_call_operand.vmem [shape: f32[32,32], index: 7, kind: input, shape index: {}]   ;;  %s1535_s8 = inlined_call_operand.vmem [shape: f32[32,1], index: 8, kind: input, shape index: {}]   ;;  %s1536_s9 = inlined_call_operand.vmem [shape: f32[32,32], index: 9, kind: input, shape index: {}]   ;;  %s1537_s10 = inlined_call_operand.vmem [shape: f32[32,1], index: 10, kind: input, shape index: {}]   ;;  %s1538_s11 = inlined_call_operand.vmem [shape: f32[8,32], index: 11, kind: input, shape index: {}]   ;;  %s1539_s12 = inlined_call_operand.vmem [shape: f32[8,1], index: 12, kind: input, shape index: {}]   ;;  %s1540_s13 = inlined_call_operand.hbm [shape: f32[8,128], index: 13, kind: output, shape index: {}]  }
   0x1   :  { %v49_v0 = vld [vmem:[%s1527_s0] sm:$0xff]  ;;  %v50_v1 = vld [vmem:[%s1527_s0 + $0x8] sm:$0xff]  ;;  %v51_v2 = vld [vmem:[%s1527_s0 + $0x10] sm:$0xff]  ;;  %1181 = vset.pattern.permute.xlu0 %v1207_v6  ;;  %1182 = vset.pattern.permute.xlu1 %v1207_v6 }
   0x2   :  { %v1090_v3 = vpack.c.bf16 %v50_v1, %v49_v0  ;;  %vm1293_vm1 = vmpackc.low %vm89_vm0, %vm89_vm0  ;;  %v52_v5 = vld [vmem:[%s1527_s0 + $0x18] sm:$0xff]  ;;  %v45_v8 = vld [vmem:[%s1528_s1] sm:$0xff] }
   0x3   :  { %v1096_v7 = vpack.c.bf16 %v52_v5, %v51_v2  ;;  %v53_v9 = vld [vmem:[%s1527_s0 + $0x20] sm:$0xff]  ;;  %v54_v10 = vld [vmem:[%s1527_s0 + $0x28] sm:$0xff]  ;;  %1017 = vmatprep.mubr.msk.f32.mxu0 %vm89_vm0, %v45_v8  ;;  %v67_v12 = vld [vmem:[%s1529_s2 + $0x10] sm:$0xff] }
   0x4   :  { %1092 = vmatprep.subr.msk.bf16.mxu0 %vm1293_vm1, %v1090_v3  ;;  %v65_v11 = vld [vmem:[%s1529_s2] sm:$0xff]  ;;  %81 = vperm.xlu1 %1182, %v67_v12   ;;  %v1102_v13 = vpack.c.bf16 %v54_v10, %v53_v9  ;;  %v66_v14 = vld [vmem:[%s1529_s2 + $0x8] sm:$0xff]  ;;  %v68_v15 = vld [vmem:[%s1529_s2 + $0x18] sm:$0xff] }
   0x5   :  { %1095 = vmatpush3.bf16.xpose.msk.msra.mxu0 %vm1293_vm1, %v1090_v3  ;;  %71 = vperm.xlu0 %1181, %v65_v11   ;;  %v55_v16 = vld [vmem:[%s1527_s0 + $0x30] sm:$0xff]  ;;  %v251_v17 = vld [vmem:[%s1531_s4] sm:$0xff]  ;;  %v56_v18 = vld [vmem:[%s1527_s0 + $0x38] sm:$0xff] }
   0x6   :  { %1098 = vmatprep.subr.msk.bf16.mxu0 %vm1293_vm1, %v1096_v7  ;;  %v252_v19 = vld [vmem:[%s1531_s4 + $0x8] sm:$0xff] }
   0x8   :  { %86 = vperm.xlu1 %1182, %v68_v15  }
   0x9   :  { %76 = vperm.xlu0 %1181, %v66_v14  }
   0xd   :  { %1101 = vmatpush3.bf16.xpose.msk.msra.mxu0 %vm1293_vm1, %v1096_v7 }
   0xe   :  { %1104 = vmatprep.subr.msk.bf16.mxu0 %vm1293_vm1, %v1102_v13 }
   0xf   :  { %18 = vsyncpa [#allocation3], 0  ;;  %257 = vperm.xlu0 %1181, %v251_v17   ;;  %v1108_v20 = vpack.c.bf16 %v56_v18, %v55_v16  ;;  %v253_v21 = vld [vmem:[%s1531_s4 + $0x10] sm:$0xff]  ;;  %262 = vperm.xlu1 %1182, %v252_v19   ;;  %v254_v22 = vld [vmem:[%s1531_s4 + $0x18] sm:$0xff]  ;;  %vm275_vm2 = vcmask 261120   ;;  %s1211_s14 = smov [#allocation2]  }
  0x10   :  { %v389_v23 = vld [vmem:[%s1533_s6] sm:$0xff]  ;;  %v58_v25 = vld [vmem:[%s1527_s0 + $0x48] sm:$0xff]  ;;  %v391_v28 = vld [vmem:[%s1533_s6 + $0x10] sm:$0xff]  ;;  %s883_s15 = sshll.u32 %s1211_s14, 4  ;;  %s884_s15 = int_to_ptr.vmem [resolvable:$true] %s883_s15 }
  0x11   :  { %v57_v24 = vld [vmem:[%s1527_s0 + $0x40] sm:$0xff]  ;;  %v390_v26 = vld [vmem:[%s1533_s6 + $0x8] sm:$0xff]  ;;  %v392_v29 = vld [vmem:[%s1533_s6 + $0x18] sm:$0xff]  ;;  %p1188_p1 = scmp.lt.s32.totalorder %s884_s15, %s884_s15 }
  0x12   :  { %v1114_v27 = vpack.c.bf16 %v58_v25, %v57_v24  ;;  %v526_v30 = vld [vmem:[%s1535_s8] sm:$0xff]  ;;  %v59_v31 = vld [vmem:[%s1527_s0 + $0x50] sm:$0xff]  ;;  %v60_v32 = vld [vmem:[%s1527_s0 + $0x58] sm:$0xff] }
  0x13   :  { %267 = vperm.xlu0 %1181, %v253_v21   ;;  %272 = vperm.xlu1 %1182, %v254_v22   ;;  %v527_v33 = vld [vmem:[%s1535_s8 + $0x8] sm:$0xff]  ;;  %v1120_v34 = vpack.c.bf16 %v60_v32, %v59_v31  ;;  %v528_v35 = vld [vmem:[%s1535_s8 + $0x10] sm:$0xff]  ;;  %v529_v36 = vld [vmem:[%s1535_s8 + $0x18] sm:$0xff]  ;;  %s1183_s8 = scalar_lea.vmem %s884_s15, 128 }
  0x14   :  { %v663_v37 = vld [vmem:[%s1537_s10] sm:$0xff]  ;;  %v62_v39 = vld [vmem:[%s1527_s0 + $0x68] sm:$0xff]  ;;  %v665_v42 = vld [vmem:[%s1537_s10 + $0x10] sm:$0xff]  ;;  %p1184_p0 = scmp.ne.s32.totalorder %s884_s15, %s1183_s8  ;;  %p1189_p2 = scmp.lt.s32.totalorder %s1183_s8, %s1183_s8 }
  0x15   :  { %1107 = vmatpush3.bf16.xpose.msk.msra.mxu0 %vm1293_vm1, %v1102_v13  ;;  %v61_v38 = vld [vmem:[%s1527_s0 + $0x60] sm:$0xff]  ;;  %v664_v40 = vld [vmem:[%s1537_s10 + $0x8] sm:$0xff]  ;;  %v666_v43 = vld [vmem:[%s1537_s10 + $0x18] sm:$0xff] }
  0x16   :  { %1110 = vmatprep.subr.msk.bf16.mxu0 %vm1293_vm1, %v1108_v20  ;;  %v1126_v41 = vpack.c.bf16 %v62_v39, %v61_v38  ;;  %v797_v44 = vld [vmem:[%s1539_s12] sm:$0xff]  ;;  %v63_v45 = vld [vmem:[%s1527_s0 + $0x70] sm:$0xff]  ;;  %v64_v46 = vld [vmem:[%s1527_s0 + $0x78] sm:$0xff]  ;;  %p1190_p3 = por %p1189_p2, %p1188_p1 }
  0x17   :  { %395 = vperm.xlu0 %1181, %v389_v23   ;;  %400 = vperm.xlu1 %1182, %v390_v26   ;;  %v1132_v47 = vpack.c.bf16 %v64_v46, %v63_v45  ;;  %v46_v48 = vld [vmem:[%s1528_s1 + $0x8] sm:$0xff]  ;;  %v47_v49 = vld [vmem:[%s1528_s1 + $0x10] sm:$0xff]  ;;  %v48_v50 = vld [vmem:[%s1528_s1 + $0x18] sm:$0xff] }
  0x18   :  { %v247_v51 = vld [vmem:[%s1530_s3] sm:$0xff]  ;;  %v248_v10 = vld [vmem:[%s1530_s3 + $0x8] sm:$0xff]  ;;  %v249_v11 = vld [vmem:[%s1530_s3 + $0x10] sm:$0xff]  ;;  %p1191_p4 = pnand %p1190_p3, %p1184_p0 }
  0x19   :  { %1031 = vmatprep.mubr.msk.f32.mxu1 %vm275_vm2, %v247_v51  ;;  %v250_v12 = vld [vmem:[%s1530_s3 + $0x18] sm:$0xff]  ;;  %v385_v13 = vld [vmem:[%s1532_s5] sm:$0xff] }
  0x1a   :  { %v388_v38 = vld [vmem:[%s1532_s5 + $0x18] sm:$0xff]  ;;  %v522_v39 = vld [vmem:[%s1534_s7] sm:$0xff] }
  0x1b   :  { %405 = vperm.xlu0 %1181, %v391_v28   ;;  %410 = vperm.xlu1 %1182, %v392_v29  }
  0x1d   :  { %1113 = vmatpush3.bf16.xpose.msk.msra.mxu0 %vm1293_vm1, %v1108_v20 }
  0x1e   :  { %1116 = vmatprep.subr.msk.bf16.mxu0 %vm1293_vm1, %v1114_v27 }
  0x1f   :  { %532 = vperm.xlu0 %1181, %v526_v30   ;;  %537 = vperm.xlu1 %1182, %v527_v33  }
  0x23   :  { %542 = vperm.xlu0 %1181, %v528_v35   ;;  %547 = vperm.xlu1 %1182, %v529_v36   ;;  %v386_v36 = vld [vmem:[%s1532_s5 + $0x8] sm:$0xff] }
  0x25   :  { %1119 = vmatpush3.bf16.xpose.msk.msra.mxu0 %vm1293_vm1, %v1114_v27 }
  0x26   :  { %1122 = vmatprep.subr.msk.bf16.mxu0 %vm1293_vm1, %v1120_v34 }
  0x27   :  { %669 = vperm.xlu0 %1181, %v663_v37   ;;  %674 = vperm.xlu1 %1182, %v664_v40   ;;  %v387_v37 = vld [vmem:[%s1532_s5 + $0x10] sm:$0xff] }
  0x2b   :  { %679 = vperm.xlu0 %1181, %v665_v42   ;;  %684 = vperm.xlu1 %1182, %v666_v43  }
  0x2d   :  { %1125 = vmatpush3.bf16.xpose.msk.msra.mxu0 %vm1293_vm1, %v1120_v34 }
  0x2e   :  { %1128 = vmatprep.subr.msk.bf16.mxu0 %vm1293_vm1, %v1126_v41 }
  0x2f   :  { %800 = vperm.xlu0 %1181, %v797_v44  }
  0x35   :  { %1131 = vmatpush3.bf16.xpose.msk.msra.mxu0 %vm1293_vm1, %v1126_v41 }
  0x36   :  { %1134 = vmatprep.subr.msk.bf16.mxu0 %vm1293_vm1, %v1132_v47 }
  0x3d   :  { %1137 = vmatpush3.bf16.xpose.msk.msra.mxu0 %vm1293_vm1, %v1132_v47 }
  0x44   :  { %1018 = vmatmul.mubr.msk.f32.vlgmr.msra.gmra.mrb[0].mxu0 %vm89_vm0, %v46_v48 }
  0x45   :  { %1020 = vmatprep.mubr.msk.f32.mxu0 %vm89_vm0, %v47_v49 }
  0x48   :  { %1021 = vmatmul.mubr.msk.f32.gmra.mrb[2].mxu0 %vm89_vm0, %v48_v50 }
  0x83   :  { %v82_v53 = vpop.permute.xlu1 %81 }
  0x84   :  { %v72_v52 = vpop.permute.xlu0 %71 }
  0x87   :  { %v87_v60 = vpop.permute.xlu1 %86 }
  0x88   :  { %v77_v54 = vpop.permute.xlu0 %76 }
  0x8e   :  { %v263_v14 = vpop.permute.xlu1 %262  ;;  %v258_v15 = vpop.permute.xlu0 %257 }
  0x92   :  { %v273_v21 = vpop.permute.xlu1 %272  ;;  %v268_v24 = vpop.permute.xlu0 %267 }
  0x96   :  { %v401_v40 = vpop.permute.xlu1 %400  ;;  %v396_v41 = vpop.permute.xlu0 %395 }
  0x9a   :  { %v411_v47 = vpop.permute.xlu1 %410  ;;  %v406_v50 = vpop.permute.xlu0 %405 }
 0x117   :  { %v1019_v55 = vpop.f32.mrb[0].mxu0 }
 0x118   :  { %v222_v56 = vadd.f32 %v1019_v55, %v77_v54  ;;  %v216_v57 = vpop.f32.mrb[1].mxu0 }
 0x119   :  { %v217_v58 = vadd.f32 %v216_v57, %v72_v52 }
 0x11a   :  { %v240_v59 = vmul.f32 0.02, %v222_v56  ;;  %vm236_vm3 = vcmp.gt.f32.partialorder %v222_v56, 0.0 }
 0x11b   :  { %v239_v61 = vmul.f32 0.02, %v217_v58  ;;  %v1022_v62 = vpop.f32.mrb[2].mxu0  ;;  %vm235_vm4 = vcmp.gt.f32.partialorder %v217_v58, 0.0 }
 0x11c   :  { %v232_v63 = vadd.f32 %v1022_v62, %v87_v60  ;;  %v226_v0 = vpop.f32.mrb[3].mxu0  ;;  %v244_v1 = vsel %vm236_vm3, %v222_v56, %v240_v59  ;;  %v523_v62 = vld [vmem:[%s1534_s7 + $0x8] sm:$0xff] }
 0x11d   :  { %v227_v2 = vadd.f32 %v226_v0, %v82_v53  ;;  %v243_v3 = vsel %vm235_vm4, %v217_v58, %v239_v61  ;;  %v525_v0 = vld [vmem:[%s1534_s7 + $0x18] sm:$0xff]  ;;  %vm1209_vm4 = vmmov 0  }
 0x11e   :  { %vm238_vm5 = vcmp.gt.f32.partialorder %v232_v63, 0.0  ;;  %v242_v4 = vmul.f32 0.02, %v232_v63  ;;  %v1138_v5 = vpack.c.bf16 %v244_v1, %v243_v3  ;;  %v659_v1 = vld [vmem:[%s1536_s9] sm:$0xff]  ;;  %v533_v3 = vpop.permute.xlu0 %532 }
 0x11f   :  { %vm237_vm6 = vcmp.gt.f32.partialorder %v227_v2, 0.0  ;;  %v241_v6 = vmul.f32 0.02, %v227_v2 }
 0x120   :  { %1139 = vmatprep.subr.bf16.mxu1 %v1138_v5  ;;  %v246_v7 = vsel %vm238_vm5, %v232_v63, %v242_v4  ;;  %v524_v63 = vld [vmem:[%s1534_s7 + $0x10] sm:$0xff] }
 0x121   :  { %1141 = vmatpush3.bf16.msra.mxu1 %v1138_v5  ;;  %v245_v8 = vsel %vm237_vm6, %v227_v2, %v241_v6  ;;  %v538_v2 = vpop.permute.xlu1 %537 }
 0x122   :  { %v1142_v9 = vpack.c.bf16 %v246_v7, %v245_v8 }
 0x124   :  { %1143 = vmatprep.subr.bf16.mxu1 %v1142_v9 }
 0x125   :  { %1145 = vmatpush3.bf16.msra.mxu1 %v1142_v9  ;;  %v548_v9 = vpop.permute.xlu1 %547 }
 0x128   :  { %1032 = vmatmul.mubr.msk.f32.vlgmr.msra.gmra.mrb[0].mxu1 %vm275_vm2, %v248_v10 }
 0x129   :  { %1034 = vmatprep.mubr.msk.f32.mxu1 %vm275_vm2, %v249_v11 }
 0x12c   :  { %1035 = vmatmul.mubr.msk.f32.gmra.mrb[2].mxu1 %vm275_vm2, %v250_v12  ;;  %v543_v12 = vpop.permute.xlu0 %542 }
 0x12d   :  { %1045 = vmatprep.mubr.msk.f32.mxu1 %vm275_vm2, %v385_v13 }
 0x1fb   :  { %v1033_v16 = vpop.f32.mrb[0].mxu1 }
 0x1fc   :  { %v360_v17 = vadd.f32 %v1033_v16, %v263_v14  ;;  %v354_v18 = vpop.f32.mrb[1].mxu1 }
 0x1fd   :  { %v355_v19 = vadd.f32 %v354_v18, %v258_v15 }
 0x1fe   :  { %vm374_vm7 = vcmp.gt.f32.partialorder %v360_v17, 0.0  ;;  %v378_v20 = vmul.f32 0.01, %v360_v17 }
 0x1ff   :  { %vm373_vm8 = vcmp.gt.f32.partialorder %v355_v19, 0.0  ;;  %v377_v22 = vmul.f32 0.01, %v355_v19  ;;  %v1036_v23 = vpop.f32.mrb[2].mxu1 }
 0x200   :  { %v370_v25 = vadd.f32 %v1036_v23, %v273_v21  ;;  %v364_v26 = vpop.f32.mrb[3].mxu1  ;;  %v382_v27 = vsel %vm374_vm7, %v360_v17, %v378_v20 }
 0x201   :  { %v365_v28 = vadd.f32 %v364_v26, %v268_v24  ;;  %v381_v29 = vsel %vm373_vm8, %v355_v19, %v377_v22  ;;  %v660_v24 = vld [vmem:[%s1536_s9 + $0x8] sm:$0xff]  ;;  %v662_v26 = vld [vmem:[%s1536_s9 + $0x18] sm:$0xff] }
 0x202   :  { %vm376_vm9 = vcmp.gt.f32.partialorder %v370_v25, 0.0  ;;  %v380_v30 = vmul.f32 0.01, %v370_v25  ;;  %v1146_v31 = vpack.c.bf16 %v382_v27, %v381_v29  ;;  %v1208_v27 = vmov 0.0|0.0   ;;  %v675_v29 = vpop.permute.xlu1 %674 }
 0x203   :  { %vm375_vm10 = vcmp.gt.f32.partialorder %v365_v28, 0.0  ;;  %v379_v32 = vmul.f32 0.01, %v365_v28 }
 0x204   :  { %1147 = vmatprep.subr.bf16.mxu1 %v1146_v31  ;;  %v384_v33 = vsel %vm376_vm9, %v370_v25, %v380_v30  ;;  %v661_v25 = vld [vmem:[%s1536_s9 + $0x10] sm:$0xff]  ;;  %v670_v30 = vpop.permute.xlu0 %669 }
 0x205   :  { %1149 = vmatpush3.bf16.msra.mxu1 %v1146_v31  ;;  %v383_v34 = vsel %vm375_vm10, %v365_v28, %v379_v32  ;;  %v1210_v28 = vmov 0.0  }
 0x206   :  { %v1150_v35 = vpack.c.bf16 %v384_v33, %v383_v34 }
 0x208   :  { %1151 = vmatprep.subr.bf16.mxu1 %v1150_v35 }
 0x209   :  { %1153 = vmatpush3.bf16.msra.mxu1 %v1150_v35 }
 0x20c   :  { %1046 = vmatmul.mubr.msk.f32.vlgmr.msra.gmra.mrb[4].mxu1 %vm275_vm2, %v386_v36  ;;  %v685_v36 = vpop.permute.xlu1 %684 }
 0x20d   :  { %1048 = vmatprep.mubr.msk.f32.mxu1 %vm275_vm2, %v387_v37 }
 0x210   :  { %1049 = vmatmul.mubr.msk.f32.gmra.mrb[6].mxu1 %vm275_vm2, %v388_v38 }
 0x211   :  { %1059 = vmatprep.mubr.msk.f32.mxu1 %vm275_vm2, %v522_v39  ;;  %v680_v39 = vpop.permute.xlu0 %679 }
 0x2df   :  { %v1047_v42 = vpop.f32.mrb[4].mxu1 }
 0x2e0   :  { %v497_v43 = vadd.f32 %v1047_v42, %v401_v40  ;;  %v491_v44 = vpop.f32.mrb[5].mxu1 }
 0x2e1   :  { %v492_v45 = vadd.f32 %v491_v44, %v396_v41 }
 0x2e2   :  { %vm511_vm11 = vcmp.gt.f32.partialorder %v497_v43, 0.0  ;;  %v515_v46 = vmul.f32 0.01, %v497_v43 }
 0x2e3   :  { %vm510_vm12 = vcmp.gt.f32.partialorder %v492_v45, 0.0  ;;  %v514_v48 = vmul.f32 0.01, %v492_v45  ;;  %v1050_v49 = vpop.f32.mrb[6].mxu1 }
 0x2e4   :  { %v507_v51 = vadd.f32 %v1050_v49, %v411_v47  ;;  %v501_v52 = vpop.f32.mrb[7].mxu1  ;;  %v519_v53 = vsel %vm511_vm11, %v497_v43, %v515_v46 }
 0x2e5   :  { %v502_v54 = vadd.f32 %v501_v52, %v406_v50  ;;  %v518_v55 = vsel %vm510_vm12, %v492_v45, %v514_v48  ;;  %v801_v52 = vpop.permute.xlu0 %800 }
 0x2e6   :  { %vm513_vm13 = vcmp.gt.f32.partialorder %v507_v51, 0.0  ;;  %v517_v56 = vmul.f32 0.01, %v507_v51  ;;  %v1154_v57 = vpack.c.bf16 %v519_v53, %v518_v55 }
 0x2e7   :  { %vm512_vm14 = vcmp.gt.f32.partialorder %v502_v54, 0.0  ;;  %v516_v58 = vmul.f32 0.01, %v502_v54 }
 0x2e8   :  { %1155 = vmatprep.subr.bf16.mxu1 %v1154_v57  ;;  %v521_v59 = vsel %vm513_vm13, %v507_v51, %v517_v56  ;;  %v796_v51 = vld [vmem:[%s1538_s11] sm:$0xff] }
 0x2e9   :  { %1157 = vmatpush3.bf16.msra.mxu1 %v1154_v57  ;;  %v520_v60 = vsel %vm512_vm14, %v502_v54, %v516_v58 }
 0x2ea   :  { %v1158_v61 = vpack.c.bf16 %v521_v59, %v520_v60 }
 0x2ec   :  { %1159 = vmatprep.subr.bf16.mxu1 %v1158_v61 }
 0x2ed   :  { %1161 = vmatpush3.bf16.msra.mxu1 %v1158_v61 }
 0x2f0   :  { %1060 = vmatmul.mubr.msk.f32.vlgmr.msra.gmra.mrb[8].mxu1 %vm275_vm2, %v523_v62 }
 0x2f1   :  { %1062 = vmatprep.mubr.msk.f32.mxu1 %vm275_vm2, %v524_v63 }
 0x2f4   :  { %1063 = vmatmul.mubr.msk.f32.gmra.mrb[10].mxu1 %vm275_vm2, %v525_v0 }
 0x2f5   :  { %1073 = vmatprep.mubr.msk.f32.mxu1 %vm275_vm2, %v659_v1 }
 0x3c3   :  { %v1061_v4 = vpop.f32.mrb[8].mxu1 }
 0x3c4   :  { %v634_v5 = vadd.f32 %v1061_v4, %v538_v2  ;;  %v628_v6 = vpop.f32.mrb[9].mxu1 }
 0x3c5   :  { %v629_v7 = vadd.f32 %v628_v6, %v533_v3 }
 0x3c6   :  { %vm648_vm15 = vcmp.gt.f32.partialorder %v634_v5, 0.0  ;;  %v652_v8 = vmul.f32 0.01, %v634_v5 }
 0x3c7   :  { %vm647_vm0 = vcmp.gt.f32.partialorder %v629_v7, 0.0  ;;  %v651_v10 = vmul.f32 0.01, %v629_v7  ;;  %v1064_v11 = vpop.f32.mrb[10].mxu1 }
 0x3c8   :  { %v644_v13 = vadd.f32 %v1064_v11, %v548_v9  ;;  %v638_v14 = vpop.f32.mrb[11].mxu1  ;;  %v656_v15 = vsel %vm648_vm15, %v634_v5, %v652_v8 }
 0x3c9   :  { %v639_v16 = vadd.f32 %v638_v14, %v543_v12  ;;  %v655_v17 = vsel %vm647_vm0, %v629_v7, %v651_v10 }
 0x3ca   :  { %vm650_vm1 = vcmp.gt.f32.partialorder %v644_v13, 0.0  ;;  %v654_v18 = vmul.f32 0.01, %v644_v13  ;;  %v1162_v19 = vpack.c.bf16 %v656_v15, %v655_v17 }
 0x3cb   :  { %vm649_vm3 = vcmp.gt.f32.partialorder %v639_v16, 0.0  ;;  %v653_v20 = vmul.f32 0.01, %v639_v16 }
 0x3cc   :  { %1163 = vmatprep.subr.bf16.mxu1 %v1162_v19  ;;  %v658_v21 = vsel %vm650_vm1, %v644_v13, %v654_v18 }
 0x3cd   :  { %1165 = vmatpush3.bf16.msra.mxu1 %v1162_v19  ;;  %v657_v22 = vsel %vm649_vm3, %v639_v16, %v653_v20 }
 0x3ce   :  { %v1166_v23 = vpack.c.bf16 %v658_v21, %v657_v22 }
 0x3d0   :  { %1167 = vmatprep.subr.bf16.mxu1 %v1166_v23 }
 0x3d1   :  { %1169 = vmatpush3.bf16.msra.mxu1 %v1166_v23 }
 0x3d2   :  { %1170 = vmatprep.subr.bf16.mxu1 %v1208_v27 }
 0x3d4   :  { %1074 = vmatmul.mubr.msk.f32.vlgmr.msra.gmra.mrb[12].mxu1 %vm275_vm2, %v660_v24 }
 0x3d5   :  { %1076 = vmatprep.mubr.msk.f32.mxu1 %vm275_vm2, %v661_v25 }
 0x3d8   :  { %1077 = vmatmul.mubr.msk.f32.gmra.mrb[14].mxu1 %vm275_vm2, %v662_v26 }
 0x3d9   :  { %1087 = vmatprep.mubr.msk.f32.mxu1 %vm1209_vm4, %v1210_v28 }
 0x4a7   :  { %v1075_v31 = vpop.f32.mrb[12].mxu1 }
 0x4a8   :  { %v771_v32 = vadd.f32 %v1075_v31, %v675_v29  ;;  %v765_v33 = vpop.f32.mrb[13].mxu1 }
 0x4a9   :  { %v766_v34 = vadd.f32 %v765_v33, %v670_v30 }
 0x4aa   :  { %vm785_vm5 = vcmp.gt.f32.partialorder %v771_v32, 0.0  ;;  %v789_v35 = vmul.f32 0.01, %v771_v32 }
 0x4ab   :  { %vm784_vm6 = vcmp.gt.f32.partialorder %v766_v34, 0.0  ;;  %v788_v37 = vmul.f32 0.01, %v766_v34  ;;  %v1078_v38 = vpop.f32.mrb[14].mxu1 }
 0x4ac   :  { %v793_v40 = vsel %vm785_vm5, %v771_v32, %v789_v35  ;;  %v781_v41 = vadd.f32 %v1078_v38, %v685_v36  ;;  %v775_v42 = vpop.f32.mrb[15].mxu1 }
 0x4ad   :  { %v792_v43 = vsel %vm784_vm6, %v766_v34, %v788_v37  ;;  %v776_v44 = vadd.f32 %v775_v42, %v680_v39 }
 0x4ae   :  { %v1171_v45 = vpack.c.bf16 %v793_v40, %v792_v43  ;;  %vm787_vm7 = vcmp.gt.f32.partialorder %v781_v41, 0.0  ;;  %v791_v46 = vmul.f32 0.01, %v781_v41 }
 0x4af   :  { %vm786_vm8 = vcmp.gt.f32.partialorder %v776_v44, 0.0  ;;  %v790_v47 = vmul.f32 0.01, %v776_v44 }
 0x4b0   :  { %v795_v48 = vsel %vm787_vm7, %v781_v41, %v791_v46  ;;  %1172 = vmatpush3.bf16.msra.mxu1 %v1171_v45 }
 0x4b1   :  { %v794_v49 = vsel %vm786_vm8, %v776_v44, %v790_v47  ;;  %1173 = vmatprep.subr.bf16.mxu1 %v1208_v27 }
 0x4b2   :  { %v1174_v50 = vpack.c.bf16 %v795_v48, %v794_v49 }
 0x4b4   :  { %1175 = vmatpush3.bf16.msra.mxu1 %v1174_v50 }
 0x4b7   :  { %1088 = vmatmul.mubr.msk.f32.vlgmr.msra.gmra.mrb[16].mxu1 %vm275_vm2, %v796_v51 }
 0x58a   :  { %v872_v53 = vpop.f32.mrb[16].mxu1 }
 0x58b   :  { %v873_v54 = vadd.f32 %v872_v53, %v801_v52  ;;  %v1089_v55 = vpop.f32.mrb[17].mxu1 }
 0x58d   :  { %876 = vst [vmem:[#allocation2] sm:$0xff] %v873_v54 }
 0x58e   :  { %1194 = shalt.err (!%p1191_p4)
}
 0x58f   :  { %s1195_s11 = scalar_lea.hbm %s1540_s13, 128 }
 0x590   :  { %p1196_p5 = scmp.ne.s32.totalorder %s1540_s13, %s1195_s11  ;;  %p1199_p6 = scmp.lt.u32.totalorder %s1195_s11, %s1540_s13 }
 0x592   :  { %p1201_p7 = pnand %p1199_p6, %p1196_p5 }
 0x594   :  { %1204 = shalt.err (!%p1201_p7)
}
 0x595   :  { %886 = dma.vmem_to_hbm [thread:$0]  %s884_s15, 128, %s1540_s13, [#allocation3]  }
 0x596   :  { %1205 = dma.done.wait [#allocation3], 128  }
 0x597   :  { %1206 = vsyncadd [#allocation3], 4294967168 }
 0x598   :  { %890 = vsyncpa [#allocation3], 1 }

</bundles_post_ra>
